<compile_context>
chip_gen: v5e
topology: v5e:2x2
jax: 0.10.0
libtpu: 0.0.40
codegen_flags: <defaults>
</compile_context>

<pallas_src>
import functools

import jax
import jax.numpy as jnp
from jax.experimental import pallas as pl
from jax.experimental.pallas import tpu as pltpu

_LANE = 128
_SUBLANE = 8
_DEFAULT_SMALL_INPUT_BYTES = 256 * 1024    # below this, plain JAX wins

# Per-generation (block_bytes, vmem_limit_bytes or None) tuned so that
# 4 * block_bytes (in + out, double-buffered) stays safely inside VMEM.
_GEN_BLOCK_CONFIG = {
    "v7x": (6 * 1024 * 1024, 40 * 1024 * 1024),   # 64 MiB phys / 32 MiB scoped
    "v6e": (8 * 1024 * 1024, 64 * 1024 * 1024),   # 128 MiB phys / 32 MiB scoped
    "v5p": (4 * 1024 * 1024, 48 * 1024 * 1024),
    "v5e": (3 * 1024 * 1024, None),               # 4x3 = 12 MiB < 16 MiB scoped
    "unknown": (2 * 1024 * 1024, None),
}


def _detect_tpu_generation():
    """Best-effort TPU generation sniff from device_kind; never raises."""
    try:
        kind = jax.devices()[0].device_kind.lower()
    except Exception:
        return "unknown"
    if "v7" in kind:
        return "v7x"
    if "v6" in kind:
        return "v6e"
    if "v5e" in kind or "v5 lite" in kind or "v5litepod" in kind:
        return "v5e"
    if "v5" in kind:
        return "v5p"
    return "unknown"


def _packed_sublane(itemsize):
    """Sublane packing granularity: 8 for 4B dtypes, 16 for 2B, 32 for 1B."""
    return _SUBLANE * max(1, 4 // max(1, itemsize))


def _lambda_kernel(x_ref, o_ref, *, func, compute_dtype):
    x = x_ref[...]
    if compute_dtype is not None and x.dtype != compute_dtype:
        x = x.astype(compute_dtype)
    o_ref[...] = func(x).astype(o_ref.dtype)


def _run_elementwise_kernel(func, slab, *, donate_input,
                            flops_per_element, transcendentals_per_element):
    """Apply `func` elementwise to a lane-dense (rows, 128) slab via Pallas."""
    rows, lanes = slab.shape
    itemsize = jnp.dtype(slab.dtype).itemsize
    gen = _detect_tpu_generation()
    block_bytes, vmem_limit = _GEN_BLOCK_CONFIG.get(
        gen, _GEN_BLOCK_CONFIG["unknown"])
    sub = _packed_sublane(itemsize)

    # Upcast sub-32-bit floats to f32 only where the VPU/EUP lack native bf16
    # (v5e and older / unknown chips). v6e/v7x keep native bf16 compute.
    compute_dtype = None
    if (jnp.issubdtype(slab.dtype, jnp.floating) and itemsize < 4
            and gen not in ("v6e", "v7x")):
        compute_dtype = jnp.float32

    # Row-tile size: ~block_bytes per block, multiple of the packed sublane
    # count, clamped so the grid has >= 2 steps whenever the slab is splittable
    # (so "parallel" actually uses both TensorCores on v7x).
    tr = block_bytes // (lanes * itemsize)
    tr = max(sub, (tr // sub) * sub)
    if rows > sub:
        half = -(-rows // 2)                 # ceil(rows / 2)
        half = -(-half // sub) * sub         # round up to packed sublane
        tr = min(tr, max(half, sub))
    tr = min(tr, rows)

    grid = (pl.cdiv(rows, tr),)
    kernel = functools.partial(_lambda_kernel, func=func,
                               compute_dtype=compute_dtype)

    n_elems = rows * lanes
    cost = pl.CostEstimate(
        flops=int(flops_per_element * n_elems),
        transcendentals=int(transcendentals_per_element * n_elems),
        bytes_accessed=int(2 * n_elems * itemsize),
    )

    compiler_kwargs = dict(dimension_semantics=("parallel",))
    # Only raise the scoped-VMEM limit when the double-buffered footprint
    # actually needs it (4 buffers of tr x lanes: in + out, each 2-deep).
    needed_vmem = 4 * tr * lanes * itemsize
    if vmem_limit is not None and needed_vmem > 12 * 1024 * 1024:
        compiler_kwargs["vmem_limit_bytes"] = vmem_limit

    call_kwargs = {}
    if donate_input:
        call_kwargs["input_output_aliases"] = {0: 0}

    return pl.pallas_call(
        kernel,
        out_shape=jax.ShapeDtypeStruct((rows, lanes), slab.dtype),
        grid_spec=pl.GridSpec(
            grid=grid,
            in_specs=[pl.BlockSpec((tr, lanes), lambda i: (i, 0))],
            out_specs=pl.BlockSpec((tr, lanes), lambda i: (i, 0)),
        ),
        compiler_params=pltpu.CompilerParams(**compiler_kwargs),
        cost_estimate=cost,
        **call_kwargs,
    )(slab)


class Lambda:
    """JAX/Pallas equivalent of the PyTorch `Lambda(nn.Module)` wrapper.

    `func` must be a jnp-traceable, shape/dtype-preserving elementwise
    function for the kernel path to be taken; otherwise use plain JAX.
    """

    def __init__(self, func, *, small_input_bytes=_DEFAULT_SMALL_INPUT_BYTES,
                 donate_input=False, flops_per_element=2.0,
                 transcendentals_per_element=1.0):
        self.func = func
        self.small_input_bytes = small_input_bytes
        self.donate_input = donate_input
        self.flops_per_element = flops_per_element
        self.transcendentals_per_element = transcendentals_per_element

    def __call__(self, x):
        orig_shape = x.shape
        n = x.size
        itemsize = jnp.dtype(x.dtype).itemsize

        # Tiny tensors: kernel dispatch + glue would dominate.
        if n == 0 or n * itemsize < self.small_input_bytes:
            return self.func(x)

        sub = _packed_sublane(itemsize)
        tile_elems = sub * _LANE

        # Ragged sizes: a pad/slice round trip would be 2 extra full-array HBM
        # passes (strictly worse than XLA's fused elementwise, which is already
        # at HBM roofline), so just apply func directly.
        if n % tile_elems != 0:
            return self.func(x)

        # Free contiguous reshape into a lane-dense (rows, 128) slab.
        slab = x.reshape(n // _LANE, _LANE)
        out_slab = _run_elementwise_kernel(
            self.func, slab,
            donate_input=self.donate_input,
            flops_per_element=self.flops_per_element,
            transcendentals_per_element=self.transcendentals_per_element,
        )
        return out_slab.reshape(orig_shape)


if __name__ == "__main__":
    key = jax.random.PRNGKey(0)
    # Small NCHW feature map: (B=2, C=4, H=16, W=16) — 2048 elements.
    x = jax.random.normal(key, (2, 4, 16, 16), dtype=jnp.float32)

    # Example wrapped function (typical CVTC usage): elementwise activation.
    func = lambda t: t * jax.nn.sigmoid(t)   # SiLU / swish
    y_ref = func(x)

    # Force the Pallas kernel path even for this small example
    # (2048 is divisible by 8*128, so the reshape-only kernel path is taken).
    module = Lambda(func, small_input_bytes=0)
    y = jax.block_until_ready(module(x))
    assert y.shape == x.shape and y.dtype == x.dtype
    assert jnp.allclose(y, y_ref, atol=1e-5, rtol=1e-5)

    # Slightly larger slab that exercises a multi-step ("parallel") grid:
    # (2, 8, 32, 32) = 16384 elements -> rows=128 -> grid of >= 2 steps.
    x_big = jax.random.normal(jax.random.PRNGKey(1), (2, 8, 32, 32),
                              dtype=jnp.float32)
    y_big = jax.block_until_ready(module(x_big))
    assert jnp.allclose(y_big, func(x_big), atol=1e-5, rtol=1e-5)

    # Ragged-size input (1155 elements): falls back to plain func(x) — the
    # kernel path would only add HBM traffic here.
    x_rag = jax.random.normal(jax.random.PRNGKey(2), (3, 5, 7, 11),
                              dtype=jnp.float32)
    y_rag = jax.block_until_ready(module(x_rag))
    assert jnp.allclose(y_rag, func(x_rag), atol=1e-5, rtol=1e-5)

    # bf16 input: native bf16 compute on v6e/v7x, f32 upcast only on v5e/older.
    x_bf = x.astype(jnp.bfloat16)
    y_bf = jax.block_until_ready(module(x_bf))
    assert y_bf.dtype == jnp.bfloat16
    assert jnp.allclose(y_bf.astype(jnp.float32),
                        func(x_bf).astype(jnp.float32),
                        atol=2e-2, rtol=2e-2)

    # Default small-input fast path (pure JAX) for tiny tensors.
    module_default = Lambda(func)
    y_fast = jax.block_until_ready(module_default(x))
    assert jnp.allclose(y_fast, y_ref, atol=1e-5, rtol=1e-5)

    print("KERNEL_OK")
</pallas_src>

<mosaic_0001>
module attributes {stable_mosaic.version = 11 : i64} {
  func.func @_lambda_kernel(%arg0: i32, %arg1: memref<8x128xf32, #tpu.memory_space<vmem>>, %arg2: memref<8x128xf32, #tpu.memory_space<vmem>>) attributes {dimension_semantics = [#tpu.dimension_semantics<parallel>], iteration_bounds = array<i64: 2>, scalar_prefetch = 0 : i64, scratch_operands = 0 : i64, tpu.core_type = #tpu.core_type<tc>, window_params = [{transform_indices = @transform_0, window_bounds = array<i64: 8, 128>}, {transform_indices = @transform_1, window_bounds = array<i64: 8, 128>}]} {
    %c0 = arith.constant 0 : index
    %c0_0 = arith.constant 0 : index
    %0 = vector.load %arg1[%c0, %c0_0] : memref<8x128xf32, #tpu.memory_space<vmem>>, vector<8x128xf32>
    %1 = arith.negf %0 : vector<8x128xf32>
    %2 = math.exp %1 : vector<8x128xf32>
    %cst = arith.constant 1.000000e+00 : f32
    %3 = vector.broadcast %cst : f32 to vector<8x128xf32>
    %4 = arith.addf %3, %2 : vector<8x128xf32>
    %5 = arith.divf %3, %4 : vector<8x128xf32>
    %6 = arith.mulf %0, %5 : vector<8x128xf32>
    %c0_1 = arith.constant 0 : index
    %c0_2 = arith.constant 0 : index
    %7 = vector.load %arg2[%c0_1, %c0_2] : memref<8x128xf32, #tpu.memory_space<vmem>>, vector<8x128xf32>
    tpu.vector_store %arg2[%c0_1, %c0_2], %6 {strides = array<i32>} : memref<8x128xf32, #tpu.memory_space<vmem>>, vector<8x128xf32>,
    return
  }
  func.func @transform_0(%arg0: i32) -> (i32, i32) {
    %c0_i32 = arith.constant 0 : i32
    %c0_i32_0 = arith.constant 0 : i32
    return %arg0, %c0_i32 : i32, i32
  }
  func.func @transform_1(%arg0: i32) -> (i32, i32) {
    %c0_i32 = arith.constant 0 : i32
    %c0_i32_0 = arith.constant 0 : i32
    return %arg0, %c0_i32 : i32, i32
  }
}

</mosaic_0001>

<bundles_post_ra>
// kernel: tpu_custom_call.1
= control target key start
LH: loop header
LB: loop body
LE: loop exit
PB: predicated region body
PF: predicated region fallthrough
CT: control target
= control target key end

     0   :  { %6 = vsyncpa [#allocation3], 0  ;;  %s540_s0 = inlined_call_operand.hbm [shape: f32[16,128], index: 0, kind: input, shape index: {}]   ;;  %s541_s1 = inlined_call_operand.hbm [shape: f32[16,128], index: 1, kind: output, shape index: {}]  }
   0x1   :  { %8 = vsyncpa [#allocation3 + $0x1], 0 }
   0x2   :  { %9 = vsyncpa [#allocation4], 0 }
   0x3   :  { %11 = vsyncpa [#allocation4 + $0x1], 0  ;;  %s413_s6 = smov 0   ;;  %s415_s7 = smov 0  }
   0x4   :  { %s417_s8 = smov 0   ;;  %s419_s9 = smov 0  }
   0x5 LB: > { %s434_s10 = sadd.s32 4294967295, %s401_s9   ;;  %s242_s11 = sadd.s32 4294967294, %s401_s9   ;;  %s401_s9 = sphi %s419_s9, %s551_s9   ;;  %s397_s8 = sphi %s417_s8, %s550_s8   ;;  %s393_s7 = sphi %s415_s7, %s549_s7   ;;  %s389_s6 = sphi %s413_s6, %s548_s6  }
   0x6   : > { %s438_s12 = sadd.s32 1, %s401_s9   ;;  %s24_s13 = sadd.s32 1, %s397_s8 }
   0x7   : > { %s21_s14 = ssub.s32 %s401_s9, %s438_s12  ;;  %p31_p0 = scmp.ne.s32.totalorder %s397_s8, %s393_s7 }
   0x8   : > { %p22_p1 = scmp.eq.s32.totalorder %s21_s14, 0  ;;  %p32_p2 = scmp.eq.s32.totalorder %s401_s9, 0 }
   0x9   : > { %p37_p3 = scmp.ne.s32.totalorder %s393_s7, %s389_s6  ;;  %p38_p4 = scmp.eq.s32.totalorder %s434_s10, 0 }
   0xa   : > { %s450_s15 = scalar_select %p22_p1, %s397_s8, %s24_s13  }
   0xb   : > { %p452_p5 = por %p32_p2, %p31_p0  ;;  %p456_p6 = por %p38_p4, %p37_p3 }
   0xc   : > { %p61_p7 = scmp.eq.s32.totalorder %s434_s10, 1  ;;  %p67_p8 = scmp.eq.s32.totalorder %s242_s11, 1 }
   0xd   : > { %p267_p10 = scmp.lt.s32.totalorder %s401_s9, 2  ;;  %s87_s20 = sand.u32 1, %s397_s8  }
   0xe   : > { %p463_p11 = por %p61_p7, %p31_p0  ;;  %p467_p12 = por %p67_p8, %p37_p3 }
   0xf   : > { %s246_s21 = sshll.u32 %s401_s9, 3  ;;  %s245_s22 = sshll.u32 %s87_s20, 3 }
  0x10   : > { %s95_s25 = scalar_lea.hbm %s540_s0, %s246_s21  ;;  %s91_s27 = scalar_lea.vmem [#allocation2], %s245_s22 }
  0x11   : > { %s97_s26 = sshll.u32 %s95_s25, 4  ;;  %s99_s28 = sshll.u32 %s91_s27, 4  ;;  %s98_s26 = int_to_ptr.hbm [resolvable:$true] %s97_s26  ;;  %s100_s28 = int_to_ptr.vmem [resolvable:$true] %s99_s28 }
  0x12   : > { %p478_p13 = pnand %p267_p10, %p452_p5  ;;  %p247_p0 = scmp.ge.s32.totalorder %s401_s9, 1 }
  0x13   : > { %p104_p1 = scmp.lt.s32.totalorder %s401_s9, 3  ;;  %s88_s30 = scalar_lea.sflag [#allocation3], %s87_s20 }
  0x14   : > { %s305_s2 = sshra.s32 %s98_s26, 4  ;;  %p309_p3 = pneg %p478_p13  ;;  %s306_s2 = int_to_ptr.hbm [resolvable:$true] %s305_s2 }
  0x15   : > { %s307_s3 = scalar_lea.hbm %s306_s2, 8  ;;  %s312_s11 = scalar_lea.hbm %s540_s0, 16 }
  0x16   : > { %p308_p2 = scmp.ne.s32.totalorder %s306_s2, %s307_s3  ;;  %p313_p5 = scmp.lt.s32.totalorder %s306_s2, %s540_s0 }
  0x17   : > { %p314_p8 = scmp.lt.s32.totalorder %s312_s11, %s307_s3 }
  0x18   : > { %p310_p4 = pnand %p309_p3, %p308_p2 }
  0x19   : > { %p315_p10 = por %p314_p8, %p313_p5 }
  0x1a   : > { %p311_p7 = pneg %p310_p4 }
  0x1c   : > { %p316_p9 = pnand %p315_p10, %p311_p7 }
  0x1e   : > { %319 = shalt.err (!%p316_p9)
}
  0x1f   : > { %262 = dma.hbm_to_vmem [thread:$0]  (!%p478_p13), %s98_s26, 128, %s100_s28, %s88_s30  }
  0x20   : > { %p105_p2 = pnand %p247_p0, %p104_p1 }
  0x21   : > { %s499_s16 = sand.u32 (!%p105_p2), 1, %s393_s7  }
  0x22   : > { %108 = sbr.rel (%p105_p2) target bundleno = 74 (0x4a), region = 24  ;;  %s248_s20 = sshll.u32 (!%p105_p2), %s499_s16, 3 }
  0x23   : > { %s111_s21 = scalar_lea.sflag (!%p105_p2), [#allocation3], %s499_s16  ;;  %s114_s22 = scalar_lea.vmem (!%p105_p2), [#allocation2], %s248_s20 }
  0x27   : > { %380 = dma.done.wait (%p456_p6), %s111_s21, 128  }
  0x28   : > { %382 = vsyncadd (%p456_p6), %s111_s21, 4294967168  ;;  %v134_v0 = vld [vmem:[%s114_s22] sm:$0xff]  ;;  %s252_s23 = sshll.u32 %s434_s10, 3  ;;  %s133_s26 = scalar_lea.vmem [#allocation5], %s248_s20 }
  0x29   : > { %v250_v1 = vmul.f32 -1.442695, %v134_v0  ;;  %s167_s25 = scalar_lea.hbm %s541_s1, %s252_s23  ;;  %s169_s27 = sshll.u32 %s133_s26, 4  ;;  %s170_s27 = int_to_ptr.vmem [resolvable:$true] %s169_s27 }
  0x2a   : > { %s171_s28 = sshll.u32 %s167_s25, 4  ;;  %s157_s10 = scalar_lea.sflag [#allocation4], %s499_s16  ;;  %s172_s28 = int_to_ptr.hbm [resolvable:$true] %s171_s28 }
  0x2b   : > { %301 = vpow2.f32 %v250_v1  ;;  %s349_s29 = sshra.s32 %s172_s28, 4  ;;  %s355_s4 = scalar_lea.hbm %s541_s1, 16  ;;  %s350_s29 = int_to_ptr.hbm [resolvable:$true] %s349_s29 }
  0x2c   : > { %s351_s30 = scalar_lea.hbm %s350_s29, 8  ;;  %p356_p0 = scmp.lt.s32.totalorder %s350_s29, %s541_s1 }
  0x2d   : > { %p352_p6 = scmp.ne.s32.totalorder %s350_s29, %s351_s30  ;;  %p357_p1 = scmp.lt.s32.totalorder %s355_s4, %s351_s30 }
  0x2f   : > { %p353_p9 = pnand %p352_p6, %p463_p11  ;;  %p358_p3 = por %p357_p1, %p356_p0 }
  0x31   : > { %v302_v2 = vpop.eup %301  ;;  %p354_p13 = pneg %p353_p9 }
  0x32   : > { %v138_v3 = vadd.f32 1.0, %v302_v2 }
  0x33   : > { %p359_p4 = pnand %p358_p3, %p354_p13 }
  0x34   : > { %303 = vrcp.f32 %v138_v3  ;;  %v150_v6 = vand.u32 2147483648, %v138_v3  ;;  %vm144_vm0 = vweird.f32 %v138_v3  ;;  %v148_v8 = vand.u32 2147483647, %v138_v3 }
  0x36   : > { %v151_v10 = vor.u32 1.1754944e-38, %v150_v6  ;;  %vm149_vm3 = vcmp.eq.f32.partialorder %v148_v8, 8.507059e+37 }
  0x3a   : > { %v304_v4 = vpop.eup %303 }
  0x3b   : > { %v140_v5 = vmul.f32 %v304_v4, %v138_v3  ;;  %vm145_vm1 = vweird.f32 %v304_v4 }
  0x3c   : > { %vm146_vm2 = vmor %vm144_vm0, %vm145_vm1 }
  0x3d   : > { %v141_v7 = vsub.f32 1.0, %v140_v5 }
  0x3f   : > { %v142_v9 = vmul.f32 %v304_v4, %v141_v7 }
  0x41   : > { %v143_v11 = vadd.f32 %v304_v4, %v142_v9 }
  0x43   : > { %v147_v12 = vsel %vm146_vm2, %v304_v4, %v143_v11 }
  0x44   : > { %v152_v13 = vsel %vm149_vm3, %v151_v10, %v147_v12 }
  0x45   : > { %v154_v14 = vmul.f32 %v152_v13, %v134_v0 }
  0x47   : > { %155 = vst [vmem:[%s133_s26] sm:$0xff] %v154_v14 }
  0x48   : > { %362 = shalt.err (!%p359_p4)
}
  0x49   : > { %257 = dma.vmem_to_hbm [thread:$0]  (%p463_p11), %s170_s27, 128, %s172_s28, %s157_s10  }
  0x4a PF: > { %s183_s13 = sand.u32 1, %s389_s6   ;;  %p547_p7 = scmp.ge.s32.totalorder %s401_s9, 2 }
  0x4b   : > { %s184_s14 = scalar_lea.sflag [#allocation4], %s183_s13 }
  0x4c   : > { %p264_p5 = pnand %p547_p7, %p467_p12 }
  0x4e   : > { %p265_p8 = pneg %p264_p5 }
  0x50   : > { %384 = dma.done.wait (%p265_p8), %s184_s14, 128  }
  0x51   : > { %386 = vsyncadd (%p265_p8), %s184_s14, 4294967168  ;;  %p14_p10 = scmp.ge.s32.totalorder %s438_s12, 4   ;;  %s548_s6 = smov %s393_s7 }
  0x52   : > { %s549_s7 = smov %s397_s8  ;;  %s550_s8 = smov %s450_s15 }
  0x53   : > { %s551_s9 = smov %s438_s12  ;;  %16 = sbr.rel (!%p14_p10) target bundleno = 5 (0x5), region = 69 }
  0x58   :  { %190 = vsyncpa [#allocation3], 1 }
  0x59   :  { %192 = vsyncpa [#allocation3 + $0x1], 1 }
  0x5a   :  { %193 = vsyncpa [#allocation4], 1 }
  0x5b   :  { %195 = vsyncpa [#allocation4 + $0x1], 1 }

</bundles_post_ra>
